<compile_context>
chip_gen: v5e
topology: v5e:2x2
jax: 0.10.0
libtpu: 0.0.40
codegen_flags: <defaults>
</compile_context>

<pallas_src>
import functools
import math

import jax
import jax.numpy as jnp
from jax.experimental import pallas as pl
from jax.experimental.pallas import tpu as pltpu


def _style_kernel(w_ref, wt_ref, bias_ref, mul_ref, add_ref, *, wscale, channels):
    # w_ref: (B, w_dim); wt_ref: (w_dim, 2C); bias_ref: (1, 2C)
    # mul_ref / add_ref: (B, C) float32
    style = jnp.dot(w_ref[...], wt_ref[...], preferred_element_type=jnp.float32)
    style = style * wscale + bias_ref[...].astype(jnp.float32)
    mul_ref[...] = style[:, :channels] + 1.0      # fold the (+1) once, here
    add_ref[...] = style[:, channels:]


def _modulate_kernel(mul_ref, add_ref, x_ref, o_ref):
    # mul_ref / add_ref: (1, C_blk, 1) -- broadcast over the lane (spatial) axis.
    # x_ref / o_ref:     (1, C_blk, HW_blk)
    o_ref[...] = x_ref[...] * mul_ref[...] + add_ref[...]


def _pick_tile(dim, target, multiple):
    """Largest divisor of `dim` that is a multiple of `multiple` and <= target.

    Falls back to the full dim (always a legal block size for a BlockSpec)."""
    if dim <= target:
        return dim
    best = None
    t = multiple
    while t <= target:
        if dim % t == 0:
            best = t
        t += multiple
    return best if best is not None else dim


def style_modulation(x, w, dense_weight, wscale_bias, *, wscale,
                     c_tile_target=64, hw_tile_target=8192):
    """x: (B, C, H, W) NCHW; w: (B, w_dim); dense_weight: (2C, w_dim); wscale_bias: (2C,)."""
    B, C, H, W = x.shape
    HW = H * W

    wt = dense_weight.T                     # (w_dim, 2C)
    bias = wscale_bias.reshape(1, 2 * C)    # (1, 2C)

    # ---- 1) Dense block: one whole-batch matmul, done once (not per grid step) ----
    mul2d, add2d = pl.pallas_call(
        functools.partial(_style_kernel, wscale=wscale, channels=C),
        out_shape=(jax.ShapeDtypeStruct((B, C), jnp.float32),
                   jax.ShapeDtypeStruct((B, C), jnp.float32)),
    )(w, wt, bias)

    # Layout plumbing once, outside the hot loop: (B, C) lane-major -> (B, C, 1)
    # sublane-major so the streaming kernel only does a free lane-broadcast read.
    mul = mul2d.reshape(B, C, 1).astype(x.dtype)
    add = add2d.reshape(B, C, 1).astype(x.dtype)

    # ---- 2) Streaming modulation over the feature map (memory-bound) ----
    # NOTE: for tiny C (< 8) the sublane axis is under-filled; acceptable for the
    # toy config, production C >= 16 is sublane-dense.
    x_flat = x.reshape(B, C, HW)
    c_blk = _pick_tile(C, c_tile_target, 8)
    hw_blk = _pick_tile(HW, hw_tile_target, 128)
    grid = (B, C // c_blk, HW // hw_blk)

    out_flat = pl.pallas_call(
        _modulate_kernel,
        out_shape=jax.ShapeDtypeStruct((B, C, HW), x.dtype),
        grid_spec=pltpu.PrefetchScalarGridSpec(
            num_scalar_prefetch=0,
            grid=grid,
            in_specs=[
                pl.BlockSpec((1, c_blk, 1), lambda b, ci, hi: (b, ci, 0)),       # mul
                pl.BlockSpec((1, c_blk, 1), lambda b, ci, hi: (b, ci, 0)),       # add
                pl.BlockSpec((1, c_blk, hw_blk), lambda b, ci, hi: (b, ci, hi)),  # x
            ],
            out_specs=pl.BlockSpec((1, c_blk, hw_blk), lambda b, ci, hi: (b, ci, hi)),
        ),
        compiler_params=pltpu.CompilerParams(
            dimension_semantics=("parallel", "parallel", "parallel"),
            vmem_limit_bytes=32 * 1024 * 1024,
        ),
    )(mul, add, x_flat)

    return out_flat.reshape(B, C, H, W)


def reference(x, w, dense_weight, wscale_bias, wscale):
    # Pure-JAX reference mirroring the PyTorch module.
    style = w @ dense_weight.T                       # nn.Linear, no bias
    style = style * wscale + wscale_bias[None, :]    # WScaleLayer (lr_mult = 1)
    B, C = x.shape[0], x.shape[1]
    style = style.reshape(B, 2, C, 1, 1)
    return x * (style[:, 0] + 1.0) + style[:, 1]


if __name__ == "__main__":
    key = jax.random.PRNGKey(0)
    k1, k2, k3 = jax.random.split(key, 3)

    # Small shapes consistent with the module's forward.
    B, C, H, W = 2, 4, 16, 16
    w_dim = 32

    x = jax.random.normal(k1, (B, C, H, W), dtype=jnp.float32)
    w = jax.random.normal(k2, (B, w_dim), dtype=jnp.float32)

    # Deterministic params (nn.Linear weight ~ small random; wscale bias = zeros).
    dense_weight = 0.05 * jax.random.normal(k3, (2 * C, w_dim), dtype=jnp.float32)
    wscale_bias = jnp.zeros((2 * C,), dtype=jnp.float32)

    # WScaleLayer: gain=1.0, kernel_size=1, lr_multiplier=1.0 -> scale = 1/sqrt(w_dim)
    wscale = 1.0 / math.sqrt(w_dim)

    out = style_modulation(x, w, dense_weight, wscale_bias, wscale=wscale)
    out = jax.block_until_ready(out)

    ref = reference(x, w, dense_weight, wscale_bias, wscale)
    assert out.shape == (B, C, H, W)
    assert jnp.allclose(out, ref, atol=1e-5, rtol=1e-5), "mismatch vs reference"

    print("KERNEL_OK")
</pallas_src>

<mosaic_0001>
module attributes {stable_mosaic.version = 11 : i64} {
  func.func @_style_kernel(%arg0: memref<2x32xf32, #tpu.memory_space<vmem>>, %arg1: memref<32x8xf32, #tpu.memory_space<vmem>>, %arg2: memref<1x8xf32, #tpu.memory_space<vmem>>, %arg3: memref<2x4xf32, #tpu.memory_space<vmem>>, %arg4: memref<2x4xf32, #tpu.memory_space<vmem>>) attributes {dimension_semantics = [], scalar_prefetch = 0 : i64, scratch_operands = 0 : i64, tpu.core_type = #tpu.core_type<tc>} {
    %c0 = arith.constant 0 : index
    %c0_0 = arith.constant 0 : index
    %0 = vector.load %arg0[%c0, %c0_0] : memref<2x32xf32, #tpu.memory_space<vmem>>, vector<2x32xf32>
    %c0_1 = arith.constant 0 : index
    %c0_2 = arith.constant 0 : index
    %1 = vector.load %arg1[%c0_1, %c0_2] : memref<32x8xf32, #tpu.memory_space<vmem>>, vector<32x8xf32>
    %cst = arith.constant dense<0.000000e+00> : vector<2x8xf32>
    %2 = tpu.matmul %0, %1, %cst {dimension_numbers = #tpu.dot_dimension_numbers<[1], [0], [0], [1], [0, 0, 1, 1], [], []>} : vector<2x32xf32>, vector<32x8xf32>, vector<2x8xf32> -> vector<2x8xf32>
    %cst_3 = arith.constant 0.176776692 : f32
    %3 = vector.broadcast %cst_3 : f32 to vector<2x8xf32>
    %4 = arith.mulf %2, %3 : vector<2x8xf32>
    %c0_4 = arith.constant 0 : index
    %c0_5 = arith.constant 0 : index
    %5 = vector.load %arg2[%c0_4, %c0_5] : memref<1x8xf32, #tpu.memory_space<vmem>>, vector<1x8xf32>
    %6 = vector.broadcast %5 : vector<1x8xf32> to vector<2x8xf32>
    %7 = arith.addf %4, %6 : vector<2x8xf32>
    %8 = vector.extract_strided_slice %7 {offsets = [0, 0], sizes = [2, 4], strides = [1, 1]} : vector<2x8xf32> to vector<2x4xf32>
    %cst_6 = arith.constant 1.000000e+00 : f32
    %9 = vector.broadcast %cst_6 : f32 to vector<2x4xf32>
    %10 = arith.addf %8, %9 : vector<2x4xf32>
    %c0_7 = arith.constant 0 : index
    %c0_8 = arith.constant 0 : index
    %11 = vector.load %arg3[%c0_7, %c0_8] : memref<2x4xf32, #tpu.memory_space<vmem>>, vector<2x4xf32>
    tpu.vector_store %arg3[%c0_7, %c0_8], %10 {strides = array<i32>} : memref<2x4xf32, #tpu.memory_space<vmem>>, vector<2x4xf32>,
    %12 = vector.extract_strided_slice %7 {offsets = [0, 4], sizes = [2, 4], strides = [1, 1]} : vector<2x8xf32> to vector<2x4xf32>
    %c0_9 = arith.constant 0 : index
    %c0_10 = arith.constant 0 : index
    %13 = vector.load %arg4[%c0_9, %c0_10] : memref<2x4xf32, #tpu.memory_space<vmem>>, vector<2x4xf32>
    tpu.vector_store %arg4[%c0_9, %c0_10], %12 {strides = array<i32>} : memref<2x4xf32, #tpu.memory_space<vmem>>, vector<2x4xf32>,
    return
  }
}

</mosaic_0001>

<bundles_post_ra>
// kernel: tpu_custom_call.1
= control target key start
LH: loop header
LB: loop body
LE: loop exit
PB: predicated region body
PF: predicated region fallthrough
CT: control target
= control target key end

     0   :  { %10 = vsyncpa [#allocation3], 0  ;;  %s202_s0 = inlined_call_operand.vmem [shape: f32[2,32], index: 0, kind: input, shape index: {}]   ;;  %s203_s1 = inlined_call_operand.vmem [shape: f32[32,8], index: 1, kind: input, shape index: {}]   ;;  %s204_s2 = inlined_call_operand.vmem [shape: f32[1,8], index: 2, kind: input, shape index: {}]   ;;  %s205_s3 = inlined_call_operand.hbm [shape: f32[2,4], index: 3, kind: output, shape index: {0}]   ;;  %s206_s4 = inlined_call_operand.hbm [shape: f32[2,4], index: 4, kind: output, shape index: {1}]  }
   0x1   :  { %v22_v0 = vld [vmem:[%s203_s1 + $0x18] sm:$0xff]  ;;  %v21_v1 = vld [vmem:[%s203_s1 + $0x10] sm:$0xff]  ;;  %v20_v2 = vld [vmem:[%s203_s1 + $0x8] sm:$0xff] }
   0x2   :  { %39 = vmatpush.msra.mxu0 %v22_v0 }
   0x3   :  { %11 = vsyncpa [#allocation5], 0  ;;  %v19_v3 = vld [vmem:[%s203_s1] sm:$0xff]  ;;  %vm23_vm0 = vcmask 261120   ;;  %s150_s27 = smov [#allocation2]   ;;  %s68_s1 = sshll.u32 %s205_s3, 4  ;;  %s69_s1 = int_to_ptr.hbm [resolvable:$true] %s68_s1 }
   0x4   :  { %40 = vmatpush.msra.mxu0 %v21_v1  ;;  %v18_v4 = vld [vmem:[%s202_s0] sm:$0x3]  ;;  %s66_s28 = sshll.u32 %s150_s27, 4  ;;  %vm54_vm1 = vcmask 25600   ;;  %s151_s5 = smov 124   ;;  %s67_s28 = int_to_ptr.vmem [resolvable:$true] %s66_s28 }
   0x5   :  { %v97_v5 = vld [vmem:[%s204_s2] ss:$0 sm:$0xff]  ;;  %s152_s0 = smov [#allocation4]   ;;  %s79_s8 = sshll.u32 %s206_s4, 4  ;;  %s80_s8 = int_to_ptr.hbm [resolvable:$true] %s79_s8 }
   0x6   :  { %41 = vmatpush.msra.mxu0 %v20_v2  ;;  %s77_s6 = sshll.u32 %s152_s0, 4  ;;  %s78_s6 = int_to_ptr.vmem [resolvable:$true] %s77_s6 }
   0x8   :  { %42 = vmatpush.msra.mxu0 %v19_v3 }
   0x9   :  { %93 = vmatmul.msk.f32.vlgmr.msra.gmra.mxu0 %vm23_vm0, %v18_v4 }
  0x86   :  { %v44_v6 = vpop.f32.mrf.mxu0 }
  0x87   :  { %v47_v7 = vmul.f32 0.17677669, %v44_v6 }
  0x89   :  { %v52_v8 = vadd.f32 %v97_v5, %v47_v7 }
  0x8b   :  { %v53_v9 = vadd.f32 1.0, %v52_v8  ;;  %57 = vrot.lane.b32.xlu0 %v52_v8, %s151_s5 }
  0x8d   :  { %55 = vst.msk [vmem:[#allocation2] sm:$0x3] %vm54_vm1, %v53_v9 }
  0x8e   :  { %71 = dma.vmem_to_hbm [thread:$0]  %s67_s28, 32, %s69_s1, [#allocation3]  }
  0xfd   :  { %v58_v10 = vpop.permute.xlu0 %57 }
  0xfe   :  { %60 = vst.msk [vmem:[#allocation4] sm:$0x3] %vm54_vm1, %v58_v10 }
  0xff   :  { %82 = dma.vmem_to_hbm [thread:$0]  %s78_s6, 32, %s80_s8, [#allocation5]  }
 0x100   :  { %146 = dma.done.wait [#allocation3], 32  }
 0x101   :  { %147 = vsyncadd [#allocation3], 4294967264 }
 0x102   :  { %148 = dma.done.wait [#allocation5], 32  }
 0x103   :  { %149 = vsyncadd [#allocation5], 4294967264 }
 0x104   :  { %91 = vsyncpa [#allocation3], 1 }
 0x105   :  { %92 = vsyncpa [#allocation5], 1 }

</bundles_post_ra>
